<compile_context>
chip_gen: v7x
topology: tpu7x:2x2x1
jax: 0.10.0
libtpu: 0.0.40
codegen_flags: <defaults>
</compile_context>

<pallas_src>
import math

import jax
import jax.numpy as jnp
from jax.experimental import pallas as pl
from jax.experimental.pallas import tpu as pltpu

_LN2 = math.log(2.0)


def _round_up(x, m):
    return ((x + m - 1) // m) * m


def _device_kind():
    try:
        return jax.devices()[0].device_kind.lower()
    except Exception:
        return ""


def _make_logcosh_kernel(rows, tile_rows, chunks, last_block):
    """Build the kernel body (static sizes closed over as Python ints)."""
    sub = tile_rows // 8
    # Valid rows in the last block (1..tile_rows); static Python int.
    rem_rows = rows - last_block * tile_rows

    def tile_sum(y_ref, yp_ref, masked):
        d = y_ref[...].astype(jnp.float32) - yp_ref[...].astype(jnp.float32)
        a = jnp.abs(d)
        # Numerically stable shifted log-cosh on the EUP:
        #   log(cosh(d)) + ln2 = |d| + log(1 + exp(-2|d|))
        # The constant ln2 is subtracted once per summed element in the JAX
        # glue (cheaper than per-element 0.5*... constants).  Combined with the
        # squared error so only one accumulator / fold is needed.
        v = a + jnp.log(1.0 + jnp.exp(jnp.float32(-2.0) * a)) + d * d
        if masked:
            # Only the tail tile can see block over-run garbage.  Mask whole
            # rows (local row index; never overflows int32) with a select so
            # garbage (possibly NaN/Inf) cannot propagate into the accumulator.
            row = jax.lax.broadcasted_iota(jnp.int32, (tile_rows, 128), 0)
            v = jnp.where(row < rem_rows, v, 0.0)
        # Fold the tile down to one vreg-shaped (8,128) partial sum with
        # aligned VPU adds (no XLU / scalar round-trip in the hot loop).
        return jnp.sum(v.reshape(sub, 8, 128), axis=0)

    def kernel(y_ref, yp_ref, acc_ref):
        s = pl.program_id(0)   # core-split axis
        i = pl.program_id(1)   # reduction-chunk axis
        b = s * chunks + i     # un-clamped flat block index

        @pl.when(i == 0)
        def _():
            acc_ref[...] = jnp.zeros_like(acc_ref)

        if rem_rows == tile_rows:
            # Every in-range block is full; clamped duplicate blocks
            # (b > last_block, present only when the split does not divide the
            # block count) contribute nothing.
            @pl.when(b <= last_block)
            def _():
                acc_ref[...] += tile_sum(y_ref, yp_ref, masked=False)
        else:
            @pl.when(b < last_block)
            def _():
                acc_ref[...] += tile_sum(y_ref, yp_ref, masked=False)

            @pl.when(b == last_block)
            def _():
                acc_ref[...] += tile_sum(y_ref, yp_ref, masked=True)

    return kernel


def log_cosh_loss(y_t, y_prime_t, *, tile_rows=None, num_splits=None,
                  core_parallel=None, vmem_limit_bytes=None):
    """Scalar mean(log(cosh(y - y'))) + mean((y - y')^2), fused in one Pallas pass."""
    assert y_t.shape == y_prime_t.shape
    n = int(y_t.size)
    assert n > 0

    kind = _device_kind()
    is_v7 = ("v7" in kind) or ("tpu7" in kind)

    # Sub-32-bit inputs pack more rows per vreg: keep native packed tiling.
    itemsize = jnp.dtype(y_t.dtype).itemsize
    packing = max(1, 4 // max(1, itemsize))
    align = 8 * packing

    if num_splits is None:
        # Only the two-TensorCore v7x benefits from the split axis; on 1-TC
        # chips (v5e/v6e) it is pure overhead.
        num_splits = 2 if is_v7 else 1
    if core_parallel is None:
        core_parallel = is_v7 and num_splits > 1
    if tile_rows is None:
        # ~1 MiB (v5e/v6e) / ~2 MiB (v7x) of f32-equivalent per input per
        # buffer; 2 inputs x 2 buffers stays well under every chip's scoped
        # VMEM default while amortizing per-grid-step overhead.
        tile_rows = min(8192, (4096 if is_v7 else 2048) * packing)

    # Keep native dtype in HBM (halves DMA for bf16/f16); upcast in-register.
    y_flat = y_t.reshape(-1)
    yp_flat = y_prime_t.reshape(-1)

    rows = pl.cdiv(n, 128)
    padded = False
    if n % 128 != 0 or rows < align:
        # Rare ragged case: pad only up to the next (align*128) boundary so a
        # lane-dense (rows,128) view exists.  Zero padding is self-cancelling:
        # each padded element contributes exactly ln2 (+0 squared error) and
        # the glue subtracts ln2 per summed element.  128-divisible sizes (the
        # common case) take the zero-copy path above this branch.
        n_pad = _round_up(n, align * 128)
        y_flat = jnp.pad(y_flat, (0, n_pad - n))
        yp_flat = jnp.pad(yp_flat, (0, n_pad - n))
        rows = n_pad // 128
        padded = True
    del padded  # (kept for readability; same math either way)

    # Tile rows: multiple of `align`, never larger than the slab (so only the
    # last block can over-run), no larger than one split's share needs.
    target = min(int(tile_rows), pl.cdiv(rows, num_splits))
    tr = max(align, (target // align) * align)

    total_blocks = pl.cdiv(rows, tr)
    chunks = pl.cdiv(total_blocks, num_splits)
    last_block = total_blocks - 1

    y2 = y_flat.reshape(rows, 128)
    yp2 = yp_flat.reshape(rows, 128)

    kernel = _make_logcosh_kernel(rows, tr, chunks, last_block)

    # Clamp the flat block index so padded grid steps (when num_splits does not
    # divide total_blocks) re-point at the last valid block; Pallas elides the
    # repeated DMA and the kernel skips their accumulation.
    def in_map(s, i):
        return (jnp.minimum(s * chunks + i, last_block), 0)

    if num_splits > 1 and core_parallel:
        dim0 = pltpu.CORE_PARALLEL   # real 2-TensorCore sharding on v7x
    elif num_splits > 1:
        dim0 = pltpu.PARALLEL
    else:
        dim0 = pltpu.ARBITRARY
    dim_sems = (dim0, pltpu.ARBITRARY)

    acc = pl.pallas_call(
        kernel,
        out_shape=jax.ShapeDtypeStruct((num_splits, 8, 128), jnp.float32),
        grid_spec=pltpu.PrefetchScalarGridSpec(
            num_scalar_prefetch=0,
            grid=(num_splits, chunks),
            in_specs=[
                pl.BlockSpec((tr, 128), in_map),
                pl.BlockSpec((tr, 128), in_map),
            ],
            out_specs=pl.BlockSpec((None, 8, 128), lambda s, i: (s, 0, 0)),
        ),
        compiler_params=pltpu.CompilerParams(
            dimension_semantics=dim_sems,
            vmem_limit_bytes=vmem_limit_bytes,
        ),
    )(y2, yp2)

    # acc holds sum over rows*128 elements of (log(cosh(d)) + ln2 + d^2); the
    # zero-padded / pad-row elements each contribute exactly ln2, which the
    # per-summed-element ln2 subtraction cancels.
    n_summed = rows * 128
    total = jnp.sum(acc)
    return (total - jnp.float32(n_summed * _LN2)) / jnp.float32(n)


if __name__ == "__main__":
    key = jax.random.PRNGKey(0)
    k1, k2, k3, k4, k5, k6 = jax.random.split(key, 6)

    # 1) NCHW-style shape (128-divisible size -> zero-copy, no-pad path).
    y_t = jax.random.normal(k1, (2, 4, 16, 16), dtype=jnp.float32)
    y_prime_t = jax.random.normal(k2, (2, 4, 16, 16), dtype=jnp.float32)
    loss = jax.block_until_ready(log_cosh_loss(y_t, y_prime_t))
    d = y_t - y_prime_t
    ref = jnp.mean(jnp.log(jnp.cosh(d + 1e-12))) + jnp.mean(d * d)
    assert jnp.allclose(loss, ref, rtol=1e-5, atol=1e-5), (loss, ref)

    # 2) Ragged size (not a multiple of 128) -> minimal-pad fallback path.
    a = jax.random.normal(k3, (3, 5, 7, 11), dtype=jnp.float32)
    b = jax.random.normal(k4, (3, 5, 7, 11), dtype=jnp.float32)
    loss2 = jax.block_until_ready(log_cosh_loss(a, b))
    d2 = a - b
    ref2 = jnp.mean(jnp.log(jnp.cosh(d2 + 1e-12))) + jnp.mean(d2 * d2)
    assert jnp.allclose(loss2, ref2, rtol=1e-5, atol=1e-5), (loss2, ref2)

    # 3) Multi-tile + split axis + masked tail tile (odd block count exercises
    #    the clamped duplicate-block skip).  core_parallel stays auto, so this
    #    is plain "parallel" (serial, harmless) on single-TensorCore chips.
    c = jax.random.normal(k5, (5, 3, 40, 128), dtype=jnp.float32)
    e = jax.random.normal(k6, (5, 3, 40, 128), dtype=jnp.float32)
    loss3 = jax.block_until_ready(log_cosh_loss(c, e, tile_rows=256, num_splits=2))
    d3 = c - e
    ref3 = jnp.mean(jnp.log(jnp.cosh(d3 + 1e-12))) + jnp.mean(d3 * d3)
    assert jnp.allclose(loss3, ref3, rtol=1e-5, atol=1e-5), (loss3, ref3)

    print("KERNEL_OK")
</pallas_src>

<mosaic_0001>
module attributes {stable_mosaic.version = 11 : i64} {
  func.func @kernel(%arg0: i32, %arg1: i32, %arg2: memref<16x128xf32, #tpu.memory_space<vmem>>, %arg3: memref<16x128xf32, #tpu.memory_space<vmem>>, %arg4: memref<1x8x128xf32, #tpu.memory_space<vmem>>) attributes {dimension_semantics = [#tpu.dimension_semantics<arbitrary>, #tpu.dimension_semantics<arbitrary>], iteration_bounds = array<i64: 1, 1>, scalar_prefetch = 0 : i64, scratch_operands = 0 : i64, tpu.core_type = #tpu.core_type<tc>, window_params = [{transform_indices = @transform_0, window_bounds = array<i64: 16, 128>}, {transform_indices = @transform_1, window_bounds = array<i64: 16, 128>}, {transform_indices = @transform_2, window_bounds = array<i64: 1, 8, 128>}]} {
    %c1_i32 = arith.constant 1 : i32
    %0 = arith.muli %arg0, %c1_i32 : i32
    %1 = arith.addi %0, %arg1 : i32
    %c0_i32 = arith.constant 0 : i32
    %2 = arith.cmpi eq, %arg1, %c0_i32 : i32
    %3 = arith.extui %2 : i1 to i32
    %c0_i32_0 = arith.constant 0 : i32
    %4 = arith.cmpi ne, %3, %c0_i32_0 : i32
    scf.if %4 {
      %cst = arith.constant 0.000000e+00 : f32
      %8 = vector.broadcast %cst : f32 to vector<8x128xf32>
      %c0 = arith.constant 0 : index
      %c0_3 = arith.constant 0 : index
      %c0_4 = arith.constant 0 : index
      %9 = vector.load %arg4[%c0, %c0_3, %c0_4] : memref<1x8x128xf32, #tpu.memory_space<vmem>>, vector<1x8x128xf32>
      %10 = vector.shape_cast %9 : vector<1x8x128xf32> to vector<8x128xf32>
      %11 = vector.shape_cast %8 : vector<8x128xf32> to vector<1x8x128xf32>
      tpu.vector_store %arg4[%c0, %c0_3, %c0_4], %11 {strides = array<i32>} : memref<1x8x128xf32, #tpu.memory_space<vmem>>, vector<1x8x128xf32>,
    } else {
    }
    %c0_i32_1 = arith.constant 0 : i32
    %5 = arith.cmpi sle, %1, %c0_i32_1 : i32
    %6 = arith.extui %5 : i1 to i32
    %c0_i32_2 = arith.constant 0 : i32
    %7 = arith.cmpi ne, %6, %c0_i32_2 : i32
    scf.if %7 {
      %c0 = arith.constant 0 : index
      %c0_3 = arith.constant 0 : index
      %c0_4 = arith.constant 0 : index
      %8 = vector.load %arg4[%c0, %c0_3, %c0_4] : memref<1x8x128xf32, #tpu.memory_space<vmem>>, vector<1x8x128xf32>
      %9 = vector.shape_cast %8 : vector<1x8x128xf32> to vector<8x128xf32>
      %c0_5 = arith.constant 0 : index
      %c0_6 = arith.constant 0 : index
      %10 = vector.load %arg2[%c0_5, %c0_6] : memref<16x128xf32, #tpu.memory_space<vmem>>, vector<16x128xf32>
      %c0_7 = arith.constant 0 : index
      %c0_8 = arith.constant 0 : index
      %11 = vector.load %arg3[%c0_7, %c0_8] : memref<16x128xf32, #tpu.memory_space<vmem>>, vector<16x128xf32>
      %12 = arith.subf %10, %11 : vector<16x128xf32>
      %13 = math.absf %12 : vector<16x128xf32>
      %cst = arith.constant -2.000000e+00 : f32
      %14 = vector.broadcast %cst : f32 to vector<16x128xf32>
      %15 = arith.mulf %14, %13 : vector<16x128xf32>
      %16 = math.exp %15 : vector<16x128xf32>
      %cst_9 = arith.constant 1.000000e+00 : f32
      %17 = vector.broadcast %cst_9 : f32 to vector<16x128xf32>
      %18 = arith.addf %17, %16 : vector<16x128xf32>
      %19 = math.log %18 : vector<16x128xf32>
      %20 = arith.addf %13, %19 : vector<16x128xf32>
      %21 = arith.mulf %12, %12 : vector<16x128xf32>
      %22 = arith.addf %20, %21 : vector<16x128xf32>
      %23 = vector.shape_cast %22 : vector<16x128xf32> to vector<2x8x128xf32>
      %cst_10 = arith.constant dense<0.000000e+00> : vector<8x128xf32>
      %24 = vector.multi_reduction <add>, %23, %cst_10 [0] : vector<2x8x128xf32> to vector<8x128xf32>
      %25 = arith.addf %9, %24 : vector<8x128xf32>
      %c0_11 = arith.constant 0 : index
      %c0_12 = arith.constant 0 : index
      %c0_13 = arith.constant 0 : index
      %26 = vector.load %arg4[%c0_11, %c0_12, %c0_13] : memref<1x8x128xf32, #tpu.memory_space<vmem>>, vector<1x8x128xf32>
      %27 = vector.shape_cast %26 : vector<1x8x128xf32> to vector<8x128xf32>
      %28 = vector.shape_cast %25 : vector<8x128xf32> to vector<1x8x128xf32>
      tpu.vector_store %arg4[%c0_11, %c0_12, %c0_13], %28 {strides = array<i32>} : memref<1x8x128xf32, #tpu.memory_space<vmem>>, vector<1x8x128xf32>,
    } else {
    }
    return
  }
  func.func @transform_0(%arg0: i32, %arg1: i32) -> (i32, i32) {
    %c1_i32 = arith.constant 1 : i32
    %0 = arith.muli %arg0, %c1_i32 : i32
    %1 = arith.addi %0, %arg1 : i32
    %c0_i32 = arith.constant 0 : i32
    %2 = arith.minsi %1, %c0_i32 : i32
    %c0_i32_0 = arith.constant 0 : i32
    %c0_i32_1 = arith.constant 0 : i32
    return %2, %c0_i32_0 : i32, i32
  }
  func.func @transform_1(%arg0: i32, %arg1: i32) -> (i32, i32) {
    %c1_i32 = arith.constant 1 : i32
    %0 = arith.muli %arg0, %c1_i32 : i32
    %1 = arith.addi %0, %arg1 : i32
    %c0_i32 = arith.constant 0 : i32
    %2 = arith.minsi %1, %c0_i32 : i32
    %c0_i32_0 = arith.constant 0 : i32
    %c0_i32_1 = arith.constant 0 : i32
    return %2, %c0_i32_0 : i32, i32
  }
  func.func @transform_2(%arg0: i32, %arg1: i32) -> (i32, i32, i32) {
    %c0_i32 = arith.constant 0 : i32
    %c0_i32_0 = arith.constant 0 : i32
    %c0_i32_1 = arith.constant 0 : i32
    return %arg0, %c0_i32, %c0_i32_0 : i32, i32, i32
  }
}

</mosaic_0001>

<bundles_post_ra>
// kernel: tpu_custom_call.1
= control target key start
LH: loop header
LB: loop body
LE: loop exit
PB: predicated region body
PF: predicated region fallthrough
CT: control target
= control target key end

     0   :  { %7 = vsyncpa [#allocation3], 0  ;;  %s262_s0 = inlined_call_operand.hbm [shape: f32[16,128], index: 0, kind: input, shape index: {}]   ;;  %s263_s1 = inlined_call_operand.hbm [shape: f32[16,128], index: 1, kind: input, shape index: {}]   ;;  %s264_s2 = inlined_call_operand.hbm [shape: f32[1,8,128], index: 2, kind: output, shape index: {}]  }
   0x1   :  { %8 = vsyncpa [#allocation6], 0 }
   0x2   :  { %9 = vsyncpa [#allocation4], 0  ;;  %s206_s9 = smov [#allocation2]   ;;  %s134_s13 = scalar_lea.hbm %s262_s0, 256 }
   0x3   :  { %s21_s10 = sshll.u32 %s206_s9, 4  ;;  %p135_p0 = scmp.ne.s32.totalorder %s262_s0, %s134_s13  ;;  %s22_s10 = int_to_ptr.vmem [resolvable:$true] %s21_s10 }
   0x4   :  { %p138_p1 = scmp.lt.u32.totalorder %s134_s13, %s262_s0 }
   0x6   :  { %p140_p2 = pnand %p138_p1, %p135_p0 }
   0x8   :  { %143 = shalt.err (!%p140_p2)
}
   0x9   :  { %s144_s18 = scalar_lea.vmem %s22_s10, 256  ;;  %p149_p4 = scmp.lt.s32.totalorder %s22_s10, %s22_s10 }
   0xa   :  { %p145_p3 = scmp.ne.s32.totalorder %s22_s10, %s144_s18  ;;  %p150_p5 = scmp.lt.s32.totalorder %s144_s18, %s144_s18 }
   0xc   :  { %p151_p6 = por %p150_p5, %p149_p4 }
   0xe   :  { %p152_p7 = pnand %p151_p6, %p145_p3 }
  0x10   :  { %155 = shalt.err (!%p152_p7)
}
  0x11   :  { %s207_s19 = smov 128   ;;  %s208_s20 = smov 8  }
  0x12   :  { %27 = dma.hbm_to_vmem [thread:$0]  %s262_s0, 256, %s22_s10, [#allocation3], %s207_s19, %s207_s19, %s208_s20  }
  0x13   :  { %s209_s23 = smov [#allocation5]   ;;  %s156_s27 = scalar_lea.hbm %s263_s1, 256 }
  0x14   :  { %s39_s24 = sshll.u32 %s209_s23, 4  ;;  %p157_p8 = scmp.ne.s32.totalorder %s263_s1, %s156_s27  ;;  %s40_s24 = int_to_ptr.vmem [resolvable:$true] %s39_s24 }
  0x15   :  { %p160_p9 = scmp.lt.u32.totalorder %s156_s27, %s263_s1 }
  0x17   :  { %p162_p10 = pnand %p160_p9, %p157_p8 }
  0x19   :  { %165 = shalt.err (!%p162_p10)
}
  0x1a   :  { %s166_s4 = scalar_lea.vmem %s40_s24, 256  ;;  %p171_p12 = scmp.lt.s32.totalorder %s40_s24, %s40_s24 }
  0x1b   :  { %p167_p11 = scmp.ne.s32.totalorder %s40_s24, %s166_s4  ;;  %p172_p13 = scmp.lt.s32.totalorder %s166_s4, %s166_s4 }
  0x1d   :  { %p173_p0 = por %p172_p13, %p171_p12 }
  0x1f   :  { %p174_p1 = pnand %p173_p0, %p167_p11 }
  0x21   :  { %177 = shalt.err (!%p174_p1)
}
  0x22   :  { %45 = dma.hbm_to_vmem [thread:$0]  %s263_s1, 256, %s40_s24, [#allocation6], %s207_s19, %s207_s19, %s208_s20  }
  0x23   :  { %200 = dma.done.wait [#allocation3], 256  }
  0x24   :  { %201 = vsyncadd [#allocation3], 4294967040 }
  0x25   :  { %202 = dma.done.wait [#allocation6], 256  }
  0x26   :  { %203 = vsyncadd [#allocation6], 4294967040  ;;  %v71_v0 = vld [vmem:[#allocation2] sm:$0xff]  ;;  %v72_v1 = vld [vmem:[#allocation2 + $0x8] sm:$0xff]  ;;  %s210_s1 = smov [#allocation7]  }
  0x27   :  { %v73_v2 = vld [vmem:[#allocation5] sm:$0xff]  ;;  %v74_v3 = vld [vmem:[#allocation5 + $0x8] sm:$0xff]  ;;  %s106_s6 = sshll.u32 %s210_s1, 4  ;;  %s107_s6 = int_to_ptr.vmem [resolvable:$true] %s106_s6 }
  0x28   :  { %v75_v4 = vsub.f32 %v71_v0, %v73_v2  ;;  %v76_v5 = vsub.f32 %v72_v1, %v74_v3  ;;  %s178_s7 = scalar_lea.vmem %s107_s6, 128  ;;  %p183_p3 = scmp.lt.s32.totalorder %s107_s6, %s107_s6 }
  0x29   :  { %p179_p2 = scmp.ne.s32.totalorder %s107_s6, %s178_s7  ;;  %p184_p4 = scmp.lt.s32.totalorder %s178_s7, %s178_s7 }
  0x2a   :  { %v77_v6 = vand.u32 2147483647, %v75_v4  ;;  %v78_v7 = vand.u32 2147483647, %v76_v5  ;;  %v93_v19 = vmul.f32 %v75_v4, %v75_v4  ;;  %v94_v21 = vmul.f32 %v76_v5, %v76_v5 }
  0x2b   :  { %p185_p5 = por %p184_p4, %p183_p3 }
  0x2c   :  { %v79_v8 = vmul.f32 -2.0, %v77_v6  ;;  %v80_v9 = vmul.f32 -2.0, %v78_v7 }
  0x2d   :  { %p186_p6 = pnand %p185_p5, %p179_p2 }
  0x2e   :  { %v81_v10 = vmul.f32 1.442695, %v79_v8  ;;  %v83_v11 = vmul.f32 1.442695, %v80_v9 }
  0x30   :  { %126 = vpow2.f32 %v81_v10 }
  0x31   :  { %128 = vpow2.f32 %v83_v11 }
  0x3a   :  { %v127_v12 = vpop.eup %126 }
  0x3b   :  { %v129_v13 = vpop.eup %128  ;;  %v85_v14 = vadd.f32 1.0, %v127_v12 }
  0x3c   :  { %v86_v15 = vadd.f32 1.0, %v129_v13 }
  0x3d   :  { %130 = vlog2.f32 %v85_v14 }
  0x3e   :  { %132 = vlog2.f32 %v86_v15 }
  0x47   :  { %v131_v16 = vpop.eup %130 }
  0x48   :  { %v133_v17 = vpop.eup %132  ;;  %v88_v18 = vmul.f32 0.6931472, %v131_v16 }
  0x49   :  { %v90_v20 = vmul.f32 0.6931472, %v133_v17 }
  0x4a   :  { %v91_v22 = vadd.f32 %v88_v18, %v77_v6 }
  0x4b   :  { %v92_v23 = vadd.f32 %v90_v20, %v78_v7 }
  0x4c   :  { %v95_v24 = vadd.f32 %v93_v19, %v91_v22 }
  0x4d   :  { %v96_v25 = vadd.f32 %v94_v21, %v92_v23 }
  0x4f   :  { %v97_v26 = vadd.f32 %v96_v25, %v95_v24 }
  0x51   :  { %99 = vst [vmem:[#allocation7] sm:$0xff] %v97_v26 }
  0x52   :  { %189 = shalt.err (!%p186_p6)
}
  0x53   :  { %s190_s10 = scalar_lea.hbm %s264_s2, 128 }
  0x54   :  { %p191_p7 = scmp.ne.s32.totalorder %s264_s2, %s190_s10  ;;  %p194_p8 = scmp.lt.u32.totalorder %s190_s10, %s264_s2 }
  0x56   :  { %p196_p9 = pnand %p194_p8, %p191_p7 }
  0x58   :  { %199 = shalt.err (!%p196_p9)
}
  0x59   :  { %109 = dma.vmem_to_hbm [thread:$0]  %s107_s6, 128, %s264_s2, [#allocation4]  }
  0x5a   :  { %204 = dma.done.wait [#allocation4], 128  }
  0x5b   :  { %205 = vsyncadd [#allocation4], 4294967168 }
  0x5c   :  { %113 = vsyncpa [#allocation3], 1 }
  0x5d   :  { %114 = vsyncpa [#allocation6], 1 }
  0x5e   :  { %115 = vsyncpa [#allocation4], 1 }

</bundles_post_ra>
